<compile_context>
chip_gen: v7x
topology: tpu7x:2x2x1
jax: 0.10.0
libtpu: 0.0.40
codegen_flags: <defaults>
</compile_context>

<pallas_src>
import jax
import jax.numpy as jnp
from jax.experimental import pallas as pl
from jax.experimental.pallas import tpu as pltpu


# ----------------------------- Pallas kernel --------------------------------

def _make_kernel(before, after):
    """Fused (before-act -> ConvTranspose2d(4,2,1) -> after-act) kernel body."""

    def kernel(xm_ref, h0_ref, h1_ref, w_ref, b_ref, o_ref, patch_ref):
        # xm_ref   : (1, tile_h, W+2, Cin)  f32   main padded-input rows
        # h0_ref   : (1, 1,      W+2, Cin)  f32   halo row (r+1)*tile_h
        # h1_ref   : (1, 1,      W+2, Cin)  f32   halo row (r+1)*tile_h + 1
        # w_ref    : (9*Cin, 4*Cout_pad)    bf16  im2col weight matrix
        # b_ref    : (1, 4*Cout_pad)        f32   phase-stacked bias
        # o_ref    : (1, tile_h*W, 4*Cout_pad) f32 phase-stacked output slab
        # patch_ref: (tile_h, W, 9*Cin)     bf16  im2col VMEM scratch
        xp = jnp.concatenate([xm_ref[0], h0_ref[0], h1_ref[0]], axis=0)
        th = xm_ref.shape[1]
        wout = xp.shape[1] - 2
        cin = xp.shape[2]

        # --- fused `before` activation (f(0) == 0 for every variant, so it is
        #     safe to apply on the zero padding).  LReLU slope 0.2 matches the
        #     PyTorch module (nn.LeakyReLU(negative_slope=0.2)).
        if before == "ReLU":
            xp = jnp.maximum(xp, 0.0)
        elif before == "LReLU":
            xp = jnp.where(xp >= 0.0, xp, 0.2 * xp)
        elif before == "Tanh":
            xp = jnp.tanh(xp)

        # --- build the im2col patch ONCE into a bf16 VMEM scratch: the 9
        #     shifted views of the padded tile are stacked on the lane dim.
        for k in range(9):
            dh, dw = divmod(k, 3)
            patch_ref[:, :, k * cin:(k + 1) * cin] = (
                xp[dh:dh + th, dw:dw + wout, :].astype(jnp.bfloat16))
        patch = patch_ref[...].reshape(th * wout, 9 * cin)

        # --- single MXU matmul, K = 9*Cin, bf16 operands, f32 accumulation.
        acc = jnp.dot(patch, w_ref[...], preferred_element_type=jnp.float32)
        acc = acc + b_ref[...]

        # --- fused `after` activation (f32, EUP).
        if after == "Tanh":
            acc = jnp.tanh(acc)
        elif after == "sigmoid":
            acc = jax.nn.sigmoid(acc)

        o_ref[0] = acc.astype(o_ref.dtype)

    return kernel


# ------------------------------- helpers -------------------------------------

def _build_weight_matrix(w_t, cout_pad):
    """PyTorch ConvTranspose2d weight (Cin, Cout, 4, 4) -> (9*Cin, 4*Cout_pad).

    Row (dh*3+dw)*Cin + ci, column (r*2+s)*Cout_pad + co holds
    w_t[ci, co, r+3-2*dh, s+3-2*dw] when that kernel tap exists, else 0.
    Returned in bf16 (MXU-native input dtype on v5e/v6e/v7x).
    """
    cin, cout = w_t.shape[0], w_t.shape[1]
    blocks = jnp.zeros((9, cin, 4, cout_pad), jnp.float32)
    for dh in range(3):
        for dw in range(3):
            for r in range(2):
                for s in range(2):
                    kh, kw = r + 3 - 2 * dh, s + 3 - 2 * dw
                    if 0 <= kh <= 3 and 0 <= kw <= 3:
                        blocks = blocks.at[dh * 3 + dw, :, r * 2 + s, :cout].set(
                            w_t[:, :, kh, kw].astype(jnp.float32))
    return blocks.reshape(9 * cin, 4 * cout_pad).astype(jnp.bfloat16)


def _vmem_limit_bytes():
    """Generation-aware VMEM budget (~75% of physical, capped)."""
    cap = 64 * 1024 * 1024                      # conservative (v7x) fallback
    try:
        cap = int(getattr(pltpu.get_tpu_info(), "vmem_capacity_bytes", cap)) or cap
    except Exception:
        pass
    return max(32 * 1024 * 1024, min(cap * 3 // 4, 112 * 1024 * 1024))


def _pick_tile_h(n, h, w, cin, c4pad, vmem_limit):
    """Largest row tile that fits the VMEM budget, shrunk a bit for pipeline
    depth / megacore work when the total grid would otherwise be tiny."""
    cands = [d for d in range(1, h + 1)
             if h % d == 0 and ((d * w) % 8 == 0 or d == h)]

    def step_bytes(th):
        inp = (th + 2) * (w + 2) * cin * 4          # main + halo rows (f32)
        out = th * w * c4pad * 4                    # output slab (f32)
        wgt = 9 * cin * c4pad * 2 + 4 * c4pad * 4   # weights (bf16) + bias
        patch = th * w * 9 * cin * 2                # im2col scratch (bf16)
        return 2 * (inp + out + wgt) + patch        # double-buffered pipeline

    fit = [d for d in cands if step_bytes(d) <= vmem_limit // 2] or [min(cands)]
    th = max(fit)
    while n * (h // th) < 4:                        # give the pipeline depth
        smaller = [d for d in fit if d < th]
        if not smaller:
            break
        th = max(smaller)
    return th


# ------------------------------- wrapper -------------------------------------

def cvti_forward(x, weight, bias=None, before=None, after=False):
    """CvTi forward.  x: (N, Cin, H, W) NCHW f32.  weight: (Cin, Cout, 4, 4).

    Returns (N, Cout, 2H, 2W) NCHW f32.
    """
    if after == "BN":
        # TODO(synk): BatchNorm2d needs learned affine + running statistics.
        raise NotImplementedError("after='BN' is not supported")

    n, cin, h, w = x.shape
    cout = weight.shape[1]
    cout_pad = -(-cout // 32) * 32        # => 4*cout_pad is a multiple of 128
    c4pad = 4 * cout_pad

    vmem_limit = _vmem_limit_bytes()
    tile_h = _pick_tile_h(n, h, w, cin, c4pad, vmem_limit)
    n_rt = h // tile_h

    # Layout plumbing: NCHW -> zero-padded NHWC (single fused XLA copy).
    xp = jnp.pad(jnp.transpose(x.astype(jnp.float32), (0, 2, 3, 1)),
                 ((0, 0), (1, 1), (1, 1), (0, 0)))      # (N, H+2, W+2, Cin)

    wblk = _build_weight_matrix(weight, cout_pad)       # (9*Cin, 4*Cout_pad)
    b4 = jnp.zeros((4, cout_pad), jnp.float32)
    if bias is not None:
        b4 = b4.at[:, :cout].set(bias.astype(jnp.float32)[None, :])
    b4 = b4.reshape(1, c4pad)

    kernel = _make_kernel(before, after)

    # Advisory cost estimate (actual MXU work, incl. structural-zero columns).
    flops = 2 * n * h * w * (9 * cin) * c4pad
    transcendentals = 0
    if before == "Tanh":
        transcendentals += n * (h + 2 * n_rt) * (w + 2) * cin
    if after in ("Tanh", "sigmoid"):
        transcendentals += n * h * w * c4pad
    bytes_accessed = (4 * xp.size + 2 * wblk.size + 4 * b4.size
                      + 4 * n * h * w * c4pad)

    out = pl.pallas_call(
        kernel,
        out_shape=jax.ShapeDtypeStruct((n, h * w, c4pad), jnp.float32),
        grid_spec=pltpu.PrefetchScalarGridSpec(
            num_scalar_prefetch=0,
            grid=(n, n_rt),
            in_specs=[
                # Non-overlapping main rows + two 1-row bottom-halo fetches
                # (blocked indexing only; top halo is the previous tile's
                # bottom, covered because main blocks start at padded row
                # r*tile_h).
                pl.BlockSpec((1, tile_h, w + 2, cin),
                             lambda b, r: (b, r, 0, 0)),
                pl.BlockSpec((1, 1, w + 2, cin),
                             lambda b, r: (b, (r + 1) * tile_h, 0, 0)),
                pl.BlockSpec((1, 1, w + 2, cin),
                             lambda b, r: (b, (r + 1) * tile_h + 1, 0, 0)),
                # Constant-index operands (stay resident across the grid).
                pl.BlockSpec((9 * cin, c4pad), lambda b, r: (0, 0)),
                pl.BlockSpec((1, c4pad), lambda b, r: (0, 0)),
            ],
            out_specs=pl.BlockSpec((1, tile_h * w, c4pad),
                                   lambda b, r: (b, r, 0)),
            scratch_shapes=[pltpu.VMEM((tile_h, w, 9 * cin), jnp.bfloat16)],
        ),
        compiler_params=pltpu.CompilerParams(
            dimension_semantics=("parallel", "parallel"),   # megacore on v7x
            vmem_limit_bytes=vmem_limit,
        ),
        cost_estimate=pl.CostEstimate(flops=int(flops),
                                      transcendentals=int(transcendentals),
                                      bytes_accessed=int(bytes_accessed)),
    )(xp, xp, xp, wblk, b4)

    # Pixel-shuffle the phase-stacked channels back to NCHW and strip the
    # Cout padding (single wrapper pass).
    out = out.reshape(n, h, w, 2, 2, cout_pad)[..., :cout]  # (n,i,j,r,s,co)
    out = jnp.transpose(out, (0, 5, 1, 3, 2, 4))            # (n,co,i,r,j,s)
    return out.reshape(n, cout, 2 * h, 2 * w)


# ------------------------------ reference ------------------------------------

def _convt_ref(x, w_t):
    """Reference ConvTranspose2d(k=4, s=2, p=1, bias=False) via dilated conv."""
    w_conv = jnp.flip(w_t, (2, 3)).transpose(1, 0, 2, 3)    # (Cout, Cin, 4, 4)
    return jax.lax.conv_general_dilated(
        x, w_conv, window_strides=(1, 1), padding=((2, 2), (2, 2)),
        lhs_dilation=(2, 2), rhs_dilation=(1, 1),
        dimension_numbers=("NCHW", "OIHW", "NCHW"),
        precision=jax.lax.Precision.HIGHEST)


if __name__ == "__main__":
    key = jax.random.PRNGKey(0)
    kx, kw = jax.random.split(key)
    N, CIN, COUT, H, W = 2, 4, 4, 16, 16

    x = jax.random.normal(kx, (N, CIN, H, W), jnp.float32)
    # ConvTranspose2d weight, PyTorch layout (Cin, Cout, kH, kW), N(0, 0.02).
    w_t = 0.02 * jax.random.normal(kw, (CIN, COUT, 4, 4), jnp.float32)

    # Default CvTi config: no `before`, no `after`, bias=False.
    out = cvti_forward(x, w_t)
    jax.block_until_ready(out)
    assert out.shape == (N, COUT, 2 * H, 2 * W), out.shape

    ref = _convt_ref(x, w_t)
    err = float(jnp.max(jnp.abs(out - ref)))
    assert err < 1e-2, f"max abs err {err}"

    # Fused before/after activation variants.
    out2 = cvti_forward(x, w_t, before="ReLU", after="Tanh")
    jax.block_until_ready(out2)
    ref2 = jnp.tanh(_convt_ref(jnp.maximum(x, 0.0), w_t))
    err2 = float(jnp.max(jnp.abs(out2 - ref2)))
    assert err2 < 1e-2, f"max abs err (ReLU/Tanh) {err2}"

    out3 = cvti_forward(x, w_t, before="LReLU", after="sigmoid")
    jax.block_until_ready(out3)
    ref3 = jax.nn.sigmoid(_convt_ref(jnp.where(x >= 0, x, 0.2 * x), w_t))
    err3 = float(jnp.max(jnp.abs(out3 - ref3)))
    assert err3 < 1e-2, f"max abs err (LReLU/sigmoid) {err3}"

    print("KERNEL_OK")
</pallas_src>

<mosaic_0001>
module attributes {stable_mosaic.version = 11 : i64} {
  func.func @kernel(%arg0: i32, %arg1: i32, %arg2: memref<1x8x18x4xf32, #tpu.memory_space<vmem>>, %arg3: memref<1x1x18x4xf32, #tpu.memory_space<vmem>>, %arg4: memref<1x1x18x4xf32, #tpu.memory_space<vmem>>, %arg5: memref<36x128xbf16, #tpu.memory_space<vmem>>, %arg6: memref<1x128xf32, #tpu.memory_space<vmem>>, %arg7: memref<1x128x128xf32, #tpu.memory_space<vmem>>, %arg8: memref<8x16x36xbf16, #tpu.memory_space<vmem>>) attributes {dimension_semantics = [#tpu.dimension_semantics<parallel>, #tpu.dimension_semantics<parallel>], iteration_bounds = array<i64: 2, 2>, scalar_prefetch = 0 : i64, scratch_operands = 1 : i64, tpu.core_type = #tpu.core_type<tc>, window_params = [{transform_indices = @transform_0, window_bounds = array<i64: 1, 8, 18, 4>}, {transform_indices = @transform_1, window_bounds = array<i64: 1, 1, 18, 4>}, {transform_indices = @transform_2, window_bounds = array<i64: 1, 1, 18, 4>}, {pipeline_mode = #tpu.pipeline_mode<synchronous>, transform_indices = @transform_3, window_bounds = array<i64: 36, 128>}, {pipeline_mode = #tpu.pipeline_mode<synchronous>, transform_indices = @transform_4, window_bounds = array<i64: 1, 128>}, {transform_indices = @transform_5, window_bounds = array<i64: 1, 128, 128>}]} {
    %c0 = arith.constant 0 : index
    %c0_0 = arith.constant 0 : index
    %c0_1 = arith.constant 0 : index
    %c0_2 = arith.constant 0 : index
    %0 = vector.load %arg2[%c0, %c0_0, %c0_1, %c0_2] : memref<1x8x18x4xf32, #tpu.memory_space<vmem>>, vector<1x8x18x4xf32>
    %1 = vector.shape_cast %0 : vector<1x8x18x4xf32> to vector<8x18x4xf32>
    %c0_3 = arith.constant 0 : index
    %c0_4 = arith.constant 0 : index
    %c0_5 = arith.constant 0 : index
    %c0_6 = arith.constant 0 : index
    %2 = vector.load %arg3[%c0_3, %c0_4, %c0_5, %c0_6] : memref<1x1x18x4xf32, #tpu.memory_space<vmem>>, vector<1x1x18x4xf32>
    %3 = vector.shape_cast %2 : vector<1x1x18x4xf32> to vector<1x18x4xf32>
    %c0_7 = arith.constant 0 : index
    %c0_8 = arith.constant 0 : index
    %c0_9 = arith.constant 0 : index
    %c0_10 = arith.constant 0 : index
    %4 = vector.load %arg4[%c0_7, %c0_8, %c0_9, %c0_10] : memref<1x1x18x4xf32, #tpu.memory_space<vmem>>, vector<1x1x18x4xf32>
    %5 = vector.shape_cast %4 : vector<1x1x18x4xf32> to vector<1x18x4xf32>
    %6 = tpu.concatenate %1, %3, %5 in 0 : vector<8x18x4xf32>, vector<1x18x4xf32>, vector<1x18x4xf32> -> vector<10x18x4xf32>
    %7 = vector.extract_strided_slice %6 {offsets = [0, 0, 0], sizes = [8, 16, 4], strides = [1, 1, 1]} : vector<10x18x4xf32> to vector<8x16x4xf32>
    %8 = arith.truncf %7 : vector<8x16x4xf32> to vector<8x16x4xbf16>
    %c0_11 = arith.constant 0 : index
    %c0_12 = arith.constant 0 : index
    %c0_13 = arith.constant 0 : index
    %9 = vector.load %arg8[%c0_11, %c0_12, %c0_13] : memref<8x16x36xbf16, #tpu.memory_space<vmem>>, vector<8x16x4xbf16>
    tpu.vector_store %arg8[%c0_11, %c0_12, %c0_13], %8 {strides = array<i32>} : memref<8x16x36xbf16, #tpu.memory_space<vmem>>, vector<8x16x4xbf16>,
    %10 = vector.extract_strided_slice %6 {offsets = [0, 1, 0], sizes = [8, 16, 4], strides = [1, 1, 1]} : vector<10x18x4xf32> to vector<8x16x4xf32>
    %11 = arith.truncf %10 : vector<8x16x4xf32> to vector<8x16x4xbf16>
    %c0_14 = arith.constant 0 : index
    %c0_15 = arith.constant 0 : index
    %c4 = arith.constant 4 : index
    %12 = vector.load %arg8[%c0_14, %c0_15, %c4] : memref<8x16x36xbf16, #tpu.memory_space<vmem>>, vector<8x16x4xbf16>
    tpu.vector_store %arg8[%c0_14, %c0_15, %c4], %11 {strides = array<i32>} : memref<8x16x36xbf16, #tpu.memory_space<vmem>>, vector<8x16x4xbf16>,
    %13 = vector.extract_strided_slice %6 {offsets = [0, 2, 0], sizes = [8, 16, 4], strides = [1, 1, 1]} : vector<10x18x4xf32> to vector<8x16x4xf32>
    %14 = arith.truncf %13 : vector<8x16x4xf32> to vector<8x16x4xbf16>
    %c0_16 = arith.constant 0 : index
    %c0_17 = arith.constant 0 : index
    %c8 = arith.constant 8 : index
    %15 = vector.load %arg8[%c0_16, %c0_17, %c8] : memref<8x16x36xbf16, #tpu.memory_space<vmem>>, vector<8x16x4xbf16>
    tpu.vector_store %arg8[%c0_16, %c0_17, %c8], %14 {strides = array<i32>} : memref<8x16x36xbf16, #tpu.memory_space<vmem>>, vector<8x16x4xbf16>,
    %16 = vector.extract_strided_slice %6 {offsets = [1, 0, 0], sizes = [8, 16, 4], strides = [1, 1, 1]} : vector<10x18x4xf32> to vector<8x16x4xf32>
    %17 = arith.truncf %16 : vector<8x16x4xf32> to vector<8x16x4xbf16>
    %c0_18 = arith.constant 0 : index
    %c0_19 = arith.constant 0 : index
    %c12 = arith.constant 12 : index
    %18 = vector.load %arg8[%c0_18, %c0_19, %c12] : memref<8x16x36xbf16, #tpu.memory_space<vmem>>, vector<8x16x4xbf16>
    tpu.vector_store %arg8[%c0_18, %c0_19, %c12], %17 {strides = array<i32>} : memref<8x16x36xbf16, #tpu.memory_space<vmem>>, vector<8x16x4xbf16>,
    %19 = vector.extract_strided_slice %6 {offsets = [1, 1, 0], sizes = [8, 16, 4], strides = [1, 1, 1]} : vector<10x18x4xf32> to vector<8x16x4xf32>
    %20 = arith.truncf %19 : vector<8x16x4xf32> to vector<8x16x4xbf16>
    %c0_20 = arith.constant 0 : index
    %c0_21 = arith.constant 0 : index
    %c16 = arith.constant 16 : index
    %21 = vector.load %arg8[%c0_20, %c0_21, %c16] : memref<8x16x36xbf16, #tpu.memory_space<vmem>>, vector<8x16x4xbf16>
    tpu.vector_store %arg8[%c0_20, %c0_21, %c16], %20 {strides = array<i32>} : memref<8x16x36xbf16, #tpu.memory_space<vmem>>, vector<8x16x4xbf16>,
    %22 = vector.extract_strided_slice %6 {offsets = [1, 2, 0], sizes = [8, 16, 4], strides = [1, 1, 1]} : vector<10x18x4xf32> to vector<8x16x4xf32>
    %23 = arith.truncf %22 : vector<8x16x4xf32> to vector<8x16x4xbf16>
    %c0_22 = arith.constant 0 : index
    %c0_23 = arith.constant 0 : index
    %c20 = arith.constant 20 : index
    %24 = vector.load %arg8[%c0_22, %c0_23, %c20] : memref<8x16x36xbf16, #tpu.memory_space<vmem>>, vector<8x16x4xbf16>
    tpu.vector_store %arg8[%c0_22, %c0_23, %c20], %23 {strides = array<i32>} : memref<8x16x36xbf16, #tpu.memory_space<vmem>>, vector<8x16x4xbf16>,
    %25 = vector.extract_strided_slice %6 {offsets = [2, 0, 0], sizes = [8, 16, 4], strides = [1, 1, 1]} : vector<10x18x4xf32> to vector<8x16x4xf32>
    %26 = arith.truncf %25 : vector<8x16x4xf32> to vector<8x16x4xbf16>
    %c0_24 = arith.constant 0 : index
    %c0_25 = arith.constant 0 : index
    %c24 = arith.constant 24 : index
    %27 = vector.load %arg8[%c0_24, %c0_25, %c24] : memref<8x16x36xbf16, #tpu.memory_space<vmem>>, vector<8x16x4xbf16>
    tpu.vector_store %arg8[%c0_24, %c0_25, %c24], %26 {strides = array<i32>} : memref<8x16x36xbf16, #tpu.memory_space<vmem>>, vector<8x16x4xbf16>,
    %28 = vector.extract_strided_slice %6 {offsets = [2, 1, 0], sizes = [8, 16, 4], strides = [1, 1, 1]} : vector<10x18x4xf32> to vector<8x16x4xf32>
    %29 = arith.truncf %28 : vector<8x16x4xf32> to vector<8x16x4xbf16>
    %c0_26 = arith.constant 0 : index
    %c0_27 = arith.constant 0 : index
    %c28 = arith.constant 28 : index
    %30 = vector.load %arg8[%c0_26, %c0_27, %c28] : memref<8x16x36xbf16, #tpu.memory_space<vmem>>, vector<8x16x4xbf16>
    tpu.vector_store %arg8[%c0_26, %c0_27, %c28], %29 {strides = array<i32>} : memref<8x16x36xbf16, #tpu.memory_space<vmem>>, vector<8x16x4xbf16>,
    %31 = vector.extract_strided_slice %6 {offsets = [2, 2, 0], sizes = [8, 16, 4], strides = [1, 1, 1]} : vector<10x18x4xf32> to vector<8x16x4xf32>
    %32 = arith.truncf %31 : vector<8x16x4xf32> to vector<8x16x4xbf16>
    %c0_28 = arith.constant 0 : index
    %c0_29 = arith.constant 0 : index
    %c32 = arith.constant 32 : index
    %33 = vector.load %arg8[%c0_28, %c0_29, %c32] : memref<8x16x36xbf16, #tpu.memory_space<vmem>>, vector<8x16x4xbf16>
    tpu.vector_store %arg8[%c0_28, %c0_29, %c32], %32 {strides = array<i32>} : memref<8x16x36xbf16, #tpu.memory_space<vmem>>, vector<8x16x4xbf16>,
    %c0_30 = arith.constant 0 : index
    %c0_31 = arith.constant 0 : index
    %c0_32 = arith.constant 0 : index
    %34 = vector.load %arg8[%c0_30, %c0_31, %c0_32] : memref<8x16x36xbf16, #tpu.memory_space<vmem>>, vector<8x16x36xbf16>
    %35 = vector.shape_cast %34 : vector<8x16x36xbf16> to vector<128x36xbf16>
    %c0_33 = arith.constant 0 : index
    %c0_34 = arith.constant 0 : index
    %36 = vector.load %arg5[%c0_33, %c0_34] : memref<36x128xbf16, #tpu.memory_space<vmem>>, vector<36x128xbf16>
    %cst = arith.constant dense<0.000000e+00> : vector<128x128xf32>
    %37 = tpu.matmul %35, %36, %cst {dimension_numbers = #tpu.dot_dimension_numbers<[1], [0], [0], [1], [0, 0, 1, 1], [], []>} : vector<128x36xbf16>, vector<36x128xbf16>, vector<128x128xf32> -> vector<128x128xf32>
    %c0_35 = arith.constant 0 : index
    %c0_36 = arith.constant 0 : index
    %38 = vector.load %arg6[%c0_35, %c0_36] : memref<1x128xf32, #tpu.memory_space<vmem>>, vector<1x128xf32>
    %39 = vector.broadcast %38 : vector<1x128xf32> to vector<128x128xf32>
    %40 = arith.addf %37, %39 : vector<128x128xf32>
    %c0_37 = arith.constant 0 : index
    %c0_38 = arith.constant 0 : index
    %c0_39 = arith.constant 0 : index
    %41 = vector.load %arg7[%c0_37, %c0_38, %c0_39] : memref<1x128x128xf32, #tpu.memory_space<vmem>>, vector<1x128x128xf32>
    %42 = vector.shape_cast %41 : vector<1x128x128xf32> to vector<128x128xf32>
    %43 = vector.shape_cast %40 : vector<128x128xf32> to vector<1x128x128xf32>
    tpu.vector_store %arg7[%c0_37, %c0_38, %c0_39], %43 {strides = array<i32>} : memref<1x128x128xf32, #tpu.memory_space<vmem>>, vector<1x128x128xf32>,
    return
  }
  func.func @transform_0(%arg0: i32, %arg1: i32) -> (i32, i32, i32, i32) {
    %c0_i32 = arith.constant 0 : i32
    %c0_i32_0 = arith.constant 0 : i32
    %c0_i32_1 = arith.constant 0 : i32
    return %arg0, %arg1, %c0_i32, %c0_i32_0 : i32, i32, i32, i32
  }
  func.func @transform_1(%arg0: i32, %arg1: i32) -> (i32, i32, i32, i32) {
    %c1_i32 = arith.constant 1 : i32
    %0 = arith.addi %arg1, %c1_i32 : i32
    %c8_i32 = arith.constant 8 : i32
    %1 = arith.muli %0, %c8_i32 : i32
    %c0_i32 = arith.constant 0 : i32
    %c0_i32_0 = arith.constant 0 : i32
    %c0_i32_1 = arith.constant 0 : i32
    return %arg0, %1, %c0_i32, %c0_i32_0 : i32, i32, i32, i32
  }
  func.func @transform_2(%arg0: i32, %arg1: i32) -> (i32, i32, i32, i32) {
    %c1_i32 = arith.constant 1 : i32
    %0 = arith.addi %arg1, %c1_i32 : i32
    %c8_i32 = arith.constant 8 : i32
    %1 = arith.muli %0, %c8_i32 : i32
    %c1_i32_0 = arith.constant 1 : i32
    %2 = arith.addi %1, %c1_i32_0 : i32
    %c0_i32 = arith.constant 0 : i32
    %c0_i32_1 = arith.constant 0 : i32
    %c0_i32_2 = arith.constant 0 : i32
    return %arg0, %2, %c0_i32, %c0_i32_1 : i32, i32, i32, i32
  }
  func.func @transform_3(%arg0: i32, %arg1: i32) -> (i32, i32) {
    %c0_i32 = arith.constant 0 : i32
    %c0_i32_0 = arith.constant 0 : i32
    %c0_i32_1 = arith.constant 0 : i32
    return %c0_i32, %c0_i32_0 : i32, i32
  }
  func.func @transform_4(%arg0: i32, %arg1: i32) -> (i32, i32) {
    %c0_i32 = arith.constant 0 : i32
    %c0_i32_0 = arith.constant 0 : i32
    %c0_i32_1 = arith.constant 0 : i32
    return %c0_i32, %c0_i32_0 : i32, i32
  }
  func.func @transform_5(%arg0: i32, %arg1: i32) -> (i32, i32, i32) {
    %c0_i32 = arith.constant 0 : i32
    %c0_i32_0 = arith.constant 0 : i32
    return %arg0, %arg1, %c0_i32 : i32, i32, i32
  }
}

</mosaic_0001>

<bundles_post_ra>
// kernel: tpu_custom_call.1
= control target key start
LH: loop header
LB: loop body
LE: loop exit
PB: predicated region body
PF: predicated region fallthrough
CT: control target
= control target key end

     0   :  { %10 = vsyncpa [#allocation4], 0  ;;  %s2048_s0 = inlined_call_operand.vmem [shape: f32[2,18,18,4], index: 0, kind: input, shape index: {}]   ;;  %s2049_s1 = inlined_call_operand.vmem [shape: f32[2,18,18,4], index: 1, kind: input, shape index: {}]   ;;  %s2050_s2 = inlined_call_operand.vmem [shape: f32[2,18,18,4], index: 2, kind: input, shape index: {}]   ;;  %s2051_s3 = inlined_call_operand.vmem [shape: bf16[36,128], index: 3, kind: input, shape index: {}]   ;;  %s2052_s4 = inlined_call_operand.vmem [shape: f32[1,128], index: 4, kind: input, shape index: {}]   ;;  %s2053_s5 = inlined_call_operand.hbm [shape: f32[2,256,128], index: 5, kind: output, shape index: {}]  }
   0x1   :  { %12 = vsyncpa [#allocation4 + $0x1], 0  ;;  %s1511_s18 = smov 0   ;;  %s1513_s19 = smov 0  }
   0x2   :  { %s1515_s20 = smov 0   ;;  %s1517_s21 = smov 0  }
   0x3   :  { %s1519_s22 = smov 0   ;;  %s1521_s23 = smov 0  }
   0x4   :  { %s1523_s24 = smov 0   ;;  %s1525_s25 = smov 0  }
   0x5 LB: > { %s1201_s26 = sadd.s32 4294967295, %s1469_s25   ;;  %s1202_s27 = sadd.s32 4294967294, %s1469_s25   ;;  %s1469_s25 = sphi %s1525_s25, %s18_s25   ;;  %s1465_s24 = sphi %s1523_s24, %s2063_s24   ;;  %s1461_s23 = sphi %s1521_s23, %s2062_s23   ;;  %s1457_s22 = sphi %s1519_s22, %s2061_s22   ;;  %s1453_s21 = sphi %s1517_s21, %s2060_s21   ;;  %s1449_s20 = sphi %s1515_s20, %s2059_s20   ;;  %s1445_s19 = sphi %s1513_s19, %s2058_s19   ;;  %s1441_s18 = sphi %s1511_s18, %s2057_s18  }
   0x6   : > { %s27_s28 = sadd.s32 1, %s1461_s23  ;;  %s30_s29 = sadd.s32 1, %s1465_s24 }
   0x7   : > { %p28_p0 = scmp.ge.s32.totalorder %s27_s28, 2  ;;  %p185_p1 = scmp.ne.s32.totalorder %s1449_s20, %s1445_s19 }
   0x8   : > { %p186_p2 = scmp.eq.s32.totalorder %s1201_s26, 3  ;;  %p191_p5 = scmp.ne.s32.totalorder %s1445_s19, %s1441_s18 }
   0x9   : > { %s2065_s28 = smov (%p28_p0, %s27_s28), 0  ;;  %s2067_s29 = smov (!%p28_p0, %s30_s29), %s1465_s24 }
   0xa   : > { %s171_s30 = ssub.s32 %s1461_s23, %s2065_s28  ;;  %p1562_p3 = por %p186_p2, %p185_p1 }
   0xb   : > { %p32_p4 = scmp.ge.s32.totalorder %s2067_s29, 2  ;;  %p192_p6 = scmp.eq.s32.totalorder %s1202_s27, 3 }
   0xc   : > { %p1209_p7 = scmp.ge.s32.totalorder %s1469_s25, 1  ;;  %p274_p9 = scmp.lt.s32.totalorder %s1469_s25, 5 }
   0xd   : > { %s2069_s29 = smov (%p32_p4, %s2067_s29), 0  ;;  %p1571_p8 = por %p192_p6, %p191_p5 }
   0xe   : > { %s170_s8 = ssub.s32 %s1465_s24, %s2069_s29  ;;  %s175_s9 = sadd.s32 1, %s1449_s20 }
   0xf   : > { %s172_s10 = sor.u32 %s171_s30, %s170_s8  ;;  %p275_p10 = pnand %p1209_p7, %p274_p9 }
  0x10   : > { %p173_p11 = scmp.eq.s32.totalorder %s172_s10, 0  ;;  %s1211_s12 = sshll.u32 (!%p275_p10), %s1453_s21, 3  ;;  %vm424_vm0 = vcmask (!%p275_p10), 31744   ;;  %vm587_vm1 = vcmask (!%p275_p10), 1046528   ;;  %vm441_vm2 = vsmask.f32 (!%p275_p10), 7424 }
  0x11   : > { %278 = sbr.rel (%p275_p10) target bundleno = 515 (0x203), region = 40  ;;  %p341_p12 = scmp.lt.s32.totalorder (!%p275_p10), %s1457_s22, 1  ;;  %vm941_vm3 = vcmask (!%p275_p10), 1041408   ;;  %vm562_vm4 = vcmask (!%p275_p10), 64544   ;;  %vm636_vm5 = vcmask (!%p275_p10), 97344   ;;  %vm671_vm6 = vcmask (!%p275_p10), 130144  }
  0x12   : > { %s1580_s11 = scalar_select %p173_p11, %s1449_s20, %s175_s9  }
  0x13   : > { %p343_p13 = scmp.lt.s32.totalorder (!%p275_p10), %s1211_s12, 17  ;;  %s1596_s9 = sadd.s32 (!%p275_p10), 8, %s1211_s12  ;;  %vm717_vm7 = vcmask (!%p275_p10), 162944   ;;  %vm754_vm8 = vcmask (!%p275_p10), 195744   ;;  %vm789_vm9 = vcmask (!%p275_p10), 228544   ;;  %vm835_vm10 = vcmask (!%p275_p10), 261344  }
  0x14   : > { %s371_s10 = sadd.s32 (!%p275_p10), 1, %s1596_s9  ;;  %p360_p0 = scmp.lt.s32.totalorder (!%p275_p10), %s1596_s9, 17  ;;  %vm872_vm11 = vcmask (!%p275_p10), 294144   ;;  %vm916_vm12 = vcmask (!%p275_p10), 293888  }
  0x15   : > { %p1639_p1 = scmp.lt.s32.totalorder (!%p275_p10), %s371_s10, 17 }
  0x18   : > { %s342_s13 = scalar_select %p341_p12, %s1457_s22, 1 }
  0x19   : > { %s344_s14 = scalar_select %p343_p13, %s1211_s12, 17 }
  0x1a   : > { %s1585_s15 = smul.u32 54, %s342_s13  ;;  %s1471_s12 = smov 12  }
  0x1b   : > { %s1288_s16 = smul.u32 3, %s344_s14  ;;  %s2071_s10 = smov (!%p1639_p1, %s371_s10), 17 }
  0x1c   : > { %s361_s14 = scalar_select %p360_p0, %s1596_s9, 17 }
  0x1d   : > { %s347_s17 = sadd.s32 %s1585_s15, %s1288_s16  ;;  %s1476_s13 = smov 24  }
  0x1e   : > { %s1212_s26 = sshll.u32 %s347_s17, 3  ;;  %s1290_s16 = smul.u32 3, %s361_s14 }
  0x1f   : > { %s1591_s8 = scalar_lea.vmem %s2048_s0, %s1212_s26  ;;  %s1472_s17 = smov 8  }
  0x20   : > { %v401_v0 = vld [vmem:[%s1591_s8 + $0x78] sm:$0xff]  ;;  %v402_v1 = vld [vmem:[%s1591_s8 + $0x80] sm:$0xff]  ;;  %v404_v5 = vld [vmem:[%s1591_s8 + $0x90] sm:$0xff]  ;;  %s1291_s26 = smul.u32 3, %s2071_s10  ;;  %s1681_s27 = sadd.s32 %s1290_s16, %s1585_s15 }
  0x21   : > { %v389_v2 = vld [vmem:[%s1591_s8 + $0x18] sm:$0xff]  ;;  %v1598_v3 = vpack.c.bf16 %v402_v1, %v401_v0  ;;  %v390_v4 = vld [vmem:[%s1591_s8 + $0x20] sm:$0xff]  ;;  %v392_v9 = vld [vmem:[%s1591_s8 + $0x30] sm:$0xff]  ;;  %s1473_s10 = smov 4   ;;  %s1478_s14 = smov 32  }
  0x22   : > { %v405_v6 = vld [vmem:[%s1591_s8 + $0x98] sm:$0xff]  ;;  %v1603_v7 = vpack.c.bf16 %v390_v4, %v389_v2  ;;  %v398_v11 = vld [vmem:[%s1591_s8 + $0x60] sm:$0xff]  ;;  %v399_v13 = vld [vmem:[%s1591_s8 + $0x68] sm:$0xff]  ;;  %s1687_s30 = sadd.s32 %s1291_s26, %s1585_s15  ;;  %s1214_s15 = sshll.u32 %s1681_s27, 3 }
  0x23   : > { %v1605_v8 = vpack.c.bf16 %v405_v6, %v404_v5  ;;  %v393_v10 = vld [vmem:[%s1591_s8 + $0x38] sm:$0xff]  ;;  %655 = vrot.lane.b32.xlu1 %v1598_v3, %s1471_s12  ;;  %v400_v14 = vld [vmem:[%s1591_s8 + $0x70] sm:$0x3]  ;;  %v386_v15 = vld [vmem:[%s1591_s8] sm:$0xff]  ;;  %430 = vst.msk [vmem:[#allocation2 + $0x28] sm:$0xff] %vm424_vm0, %v1598_v3  ;;  %v1623_v16 = vpack.c.bf16 %v399_v13, %v398_v11  ;;  %v603_v21 = vrot.slane %v1598_v3, 1  ;;  %s366_s16 = scalar_lea.vmem %s2049_s1, %s1214_s15 }
  0x24   : > { %v1613_v12 = vpack.c.bf16 %v393_v10, %v392_v9  ;;  %647 = vrot.lane.b32.xlu0 %v1603_v7, %s1471_s12  ;;  %v1625_v17 = vpack.c.bf16 %v400_v14, %v400_v14  ;;  %v387_v18 = vld [vmem:[%s1591_s8 + $0x8] sm:$0xff]  ;;  %v388_v19 = vld [vmem:[%s1591_s8 + $0x10] sm:$0x3]  ;;  %426 = vst.msk [vmem:[#allocation2 + $0x8] sm:$0xff] %vm424_vm0, %v1603_v7  ;;  %v591_v26 = vrot.slane %v1603_v7, 1  ;;  %v457_v30 = vshll.u32 %v1603_v7, 16 }
  0x25   : > { %v403_v20 = vld [vmem:[%s1591_s8 + $0x88] sm:$0x3]  ;;  %431 = vst.msk [vmem:[#allocation2 + $0x30] sm:$0xff] %vm424_vm0, %v1605_v8  ;;  %v416_v22 = vpack.c.bf16 %v387_v18, %v386_v15  ;;  %v433_v23 = vpack.c.bf16 %v388_v19, %v388_v19  ;;  %v600_v27 = vrot.slane %v1623_v16, 1  ;;  %429 = vst.msk [vmem:[#allocation2 + $0x20] sm:$0xff] %vm424_vm0, %v1623_v16  ;;  %v455_v34 = vshrl.u32 %v1603_v7, 16 }
  0x26   : > { %v438_v24 = vpack.c.bf16 %v403_v20, %v403_v20  ;;  %v391_v25 = vld [vmem:[%s1591_s8 + $0x28] sm:$0x3]  ;;  %427 = vst.msk [vmem:[#allocation2 + $0x10] sm:$0xff] %vm424_vm0, %v1613_v12  ;;  %v601_v28 = vrot.slane %v1625_v17, 1  ;;  %v459_v37 = vrot.slane %v457_v30, 1  ;;  %v503_v43 = vshrl.u32 %v1598_v3, 16 }
  0x27   : > { %v434_v29 = vpack.c.bf16 %v391_v25, %v391_v25  ;;  %657 = vrot.lane.b32.xlu1 %v1605_v8, %s1471_s12  ;;  %v588_v31 = vrot.slane %v416_v22, 1  ;;  %v589_v32 = vrot.slane %v433_v23, 1  ;;  %425 = vst.msk [vmem:[#allocation2] sm:$0xff] %vm424_vm0, %v416_v22  ;;  %v443_v40 = vshrl.u32 %v416_v22, 16  ;;  %v406_v53 = vld [vmem:[%s1591_s8 + $0xa0] sm:$0x3] }
  0x28   : > { %v604_v33 = vrot.slane %v438_v24, 1  ;;  %649 = vrot.lane.b32.xlu0 %v1613_v12, %s1471_s12  ;;  %v1657_v35 = vsel %vm587_vm1, %v600_v27, %v601_v28  ;;  %v445_v41 = vshll.u32 %v416_v22, 16  ;;  %v450_v42 = vshll.u32 %v433_v23, 16  ;;  %v394_v58 = vld [vmem:[%s1591_s8 + $0x40] sm:$0x3]  ;;  %v407_v4 = vld [vmem:[%s1591_s8 + $0xa8] sm:$0xff] }
  0x29   : > { %v592_v36 = vrot.slane %v434_v29, 1  ;;  %v462_v38 = vshll.u32 %v434_v29, 16  ;;  %v590_v39 = vsel %vm587_vm1, %v588_v31, %v589_v32  ;;  %v505_v44 = vshll.u32 %v1598_v3, 16  ;;  %v408_v5 = vld [vmem:[%s1591_s8 + $0xb0] sm:$0xff]  ;;  %v395_v10 = vld [vmem:[%s1591_s8 + $0x48] sm:$0xff]  ;;  %s1216_s9 = sshll.u32 %s1687_s30, 3 }
  0x2a   : > { %v1672_v45 = vsel %vm587_vm1, %v603_v21, %v604_v33  ;;  %v460_v46 = vor.u32 %v459_v37, %v455_v34  ;;  %v447_v48 = vrot.slane %v445_v41, 1  ;;  %v510_v51 = vshll.u32 %v438_v24, 16  ;;  %v396_v11 = vld [vmem:[%s1591_s8 + $0x50] sm:$0xff]  ;;  %s380_s30 = scalar_lea.vmem %s2050_s2, %s1216_s9  ;;  %v410_v24 = vld [vmem:[%s366_s16] sm:$0xff]  ;;  %v411_v25 = vld [vmem:[%s366_s16 + $0x8] sm:$0xff]  ;;  %s1474_s15 = smov 16  }
  0x2b   : > { %620 = vrot.lane.b32.xlu1 %v1657_v35, %s1472_s17  ;;  %v464_v47 = vrot.slane %v462_v38, 1  ;;  %v1676_v49 = vsel %vm587_vm1, %v591_v26, %v592_v36  ;;  %v507_v50 = vrot.slane %v505_v44, 1  ;;  %v493_v52 = vshll.u32 %v1623_v16, 16  ;;  %v412_v28 = vld [vmem:[%s366_s16 + $0x10] sm:$0x3]  ;;  %v413_v29 = vld [vmem:[%s380_s30] sm:$0xff] }
  0x2c   : > { %612 = vrot.lane.b32.xlu0 %v590_v39, %s1472_s17  ;;  %v448_v54 = vor.u32 %v447_v48, %v443_v40  ;;  %v452_v55 = vrot.slane %v450_v42, 1  ;;  %v491_v56 = vshrl.u32 %v1623_v16, 16  ;;  %v498_v57 = vshll.u32 %v1625_v17, 16  ;;  %v414_v30 = vld [vmem:[%s380_s30 + $0x8] sm:$0xff]  ;;  %v415_v34 = vld [vmem:[%s380_s30 + $0x10] sm:$0x3] }
  0x2d   : > { %v495_v59 = vrot.slane %v493_v52, 1  ;;  %v465_v60 = vsel %vm441_vm2, %v460_v46, %v464_v47  ;;  %v1692_v61 = vpack.c.bf16 %v406_v53, %v406_v53  ;;  %v517_v62 = vshll.u32 %v1605_v8, 16  ;;  %s1475_s9 = smov 20   ;;  %s1477_s16 = smov 28  }
  0x2e   : > { %v508_v63 = vor.u32 %v507_v50, %v503_v43  ;;  %v512_v0 = vrot.slane %v510_v51, 1  ;;  %v1697_v1 = vpack.c.bf16 %v394_v58, %v394_v58  ;;  %v469_v2 = vshll.u32 %v1613_v12, 16  ;;  %s1231_s26 = sshll.u32 %s1457_s22, 5 }
  0x2f   : > { %622 = vrot.lane.b32.xlu1 %v1672_v45, %s1472_s17  ;;  %v453_v6 = vsel %vm441_vm2, %v448_v54, %v452_v55  ;;  %v496_v7 = vor.u32 %v495_v59, %v491_v56  ;;  %v500_v9 = vrot.slane %v498_v57, 1  ;;  %v515_v13 = vshrl.u32 %v1605_v8, 16 }
  0x30   : > { %614 = vrot.lane.b32.xlu0 %v1676_v49, %s1472_s17  ;;  %v519_v14 = vrot.slane %v517_v62, 1  ;;  %v522_v15 = vshll.u32 %v1692_v61, 16  ;;  %v467_v17 = vshrl.u32 %v1613_v12, 16  ;;  %v1711_v18 = vpack.c.bf16 %v408_v5, %v407_v4 }
  0x31   : > { %v1718_v19 = vsel %vm441_vm2, %v508_v63, %v512_v0  ;;  %v471_v20 = vrot.slane %v469_v2, 1  ;;  %v474_v21 = vshll.u32 %v1697_v1, 16  ;;  %v1721_v22 = vpack.c.bf16 %v396_v11, %v395_v10 }
  0x32   : > { %v1727_v23 = vsel %vm441_vm2, %v496_v7, %v500_v9  ;;  %432 = vst.msk [vmem:[#allocation2 + $0x38] sm:$0xff] %vm424_vm0, %v1711_v18  ;;  %v520_v26 = vor.u32 %v519_v14, %v515_v13  ;;  %v524_v27 = vrot.slane %v522_v15, 1  ;;  %v1737_v33 = vpack.c.bf16 %v411_v25, %v410_v24  ;;  %v397_v7 = vld [vmem:[%s1591_s8 + $0x58] sm:$0x3] }
  0x33   : > { %540 = vrot.lane.b32.xlu1 %v465_v60, %s1473_s10  ;;  %428 = vst.msk [vmem:[#allocation2 + $0x18] sm:$0xff] %vm424_vm0, %v1721_v22  ;;  %v472_v31 = vor.u32 %v471_v20, %v467_v17  ;;  %v476_v32 = vrot.slane %v474_v21, 1  ;;  %v680_v36 = vpack.c.bf16 %v412_v28, %v412_v28  ;;  %v1739_v37 = vpack.c.bf16 %v414_v30, %v413_v29  ;;  %v1373_v29 = vld [vmem:[%s2051_s3 + $0x8] sm:$0xff]   ;;  %v1374_v30 = vld [vmem:[%s2051_s3 + $0x10] ss:$0 sps:$4 sm:$0x33]  }
  0x34   : > { %538 = vrot.lane.b32.xlu0 %v453_v6, %s1473_s10  ;;  %v1744_v38 = vsel %vm441_vm2, %v520_v26, %v524_v27  ;;  %v682_v39 = vshrl.u32 %v1737_v33, 16  ;;  %v684_v40 = vshll.u32 %v1737_v33, 16  ;;  %v727_v41 = vrot.slane %v1737_v33, 1 }
  0x35   : > { %v1751_v42 = vsel %vm441_vm2, %v472_v31, %v476_v32  ;;  %v689_v43 = vshll.u32 %v680_v36, 16  ;;  %v728_v44 = vrot.slane %v680_v36, 1  ;;  %v798_v46 = vpack.c.bf16 %v415_v34, %v415_v34 }
  0x36   : > { %v686_v47 = vrot.slane %v684_v40, 1  ;;  %v800_v48 = vshrl.u32 %v1739_v37, 16  ;;  %v802_v50 = vshll.u32 %v1739_v37, 16  ;;  %v845_v51 = vrot.slane %v1739_v37, 1 }
  0x37   : > { %548 = vrot.lane.b32.xlu1 %v1718_v19, %s1473_s10  ;;  %v691_v52 = vrot.slane %v689_v43, 1  ;;  %v1757_v53 = vsel %vm587_vm1, %v727_v41, %v728_v44  ;;  %v807_v54 = vshll.u32 %v798_v46, 16  ;;  %v846_v55 = vrot.slane %v798_v46, 1 }
  0x38   : > { %546 = vrot.lane.b32.xlu0 %v1727_v23, %s1473_s10  ;;  %v687_v56 = vor.u32 %v686_v47, %v682_v39  ;;  %v804_v57 = vrot.slane %v802_v50, 1  ;;  %v606_v58 = vrot.slane %v1605_v8, 1  ;;  %v607_v59 = vrot.slane %v1692_v61, 1 }
  0x39   : > { %v1766_v62 = vsel %vm587_vm1, %v845_v51, %v846_v55  ;;  %v594_v63 = vrot.slane %v1613_v12, 1  ;;  %v595_v0 = vrot.slane %v1697_v1, 1  ;;  %v409_v1 = vld [vmem:[%s1591_s8 + $0xb8] sm:$0x3]  ;;  %v529_v10 = vshll.u32 %v1711_v18, 16 }
  0x3a   : > { %v1771_v2 = vsel %vm441_vm2, %v687_v56, %v691_v52  ;;  %v805_v4 = vor.u32 %v804_v57, %v800_v48  ;;  %v1781_v61 = vsel %vm587_vm1, %v606_v58, %v607_v59  ;;  %v440_v9 = vpack.c.bf16 %v409_v1, %v409_v1 }
  0x3b   : > { %701 = vrot.lane.b32.xlu1 %v1718_v19, %s1474_s15  ;;  %v1784_v6 = vsel %vm587_vm1, %v594_v63, %v595_v0  ;;  %v436_v11 = vpack.c.bf16 %v397_v7, %v397_v7  ;;  %v527_v13 = vshrl.u32 %v1711_v18, 16  ;;  %v531_v14 = vrot.slane %v529_v10, 1 }
  0x3c   : > { %693 = vrot.lane.b32.xlu0 %v465_v60, %s1474_s15  ;;  %v809_v60 = vrot.slane %v807_v54, 1  ;;  %v534_v15 = vshll.u32 %v440_v9, 16  ;;  %v479_v17 = vshrl.u32 %v1721_v22, 16  ;;  %v943_v31 = vsel %vm941_vm3, %v1374_v30, 0 }
  0x3d   : > { %v486_v21 = vshll.u32 %v436_v11, 16  ;;  %v532_v24 = vor.u32 %v531_v14, %v527_v13  ;;  %v609_v32 = vrot.slane %v1711_v18, 1  ;;  %v610_v34 = vrot.slane %v440_v9, 1 }
  0x3e   : > { %v1776_v5 = vsel %vm441_vm2, %v805_v4, %v809_v60  ;;  %v536_v25 = vrot.slane %v534_v15, 1  ;;  %v597_v36 = vrot.slane %v1721_v22, 1  ;;  %v598_v39 = vrot.slane %v436_v11, 1 }
  0x3f   : > { %703 = vrot.lane.b32.xlu1 %v1744_v38, %s1474_s15  ;;  %v488_v26 = vrot.slane %v486_v21, 1  ;;  %v611_v40 = vsel %vm587_vm1, %v609_v32, %v610_v34 }
  0x40   : > { %695 = vrot.lane.b32.xlu0 %v1751_v42, %s1474_s15  ;;  %v537_v27 = vsel %vm441_vm2, %v532_v24, %v536_v25  ;;  %v599_v41 = vsel %vm587_vm1, %v597_v36, %v598_v39 }
  0x43   : > { %738 = vrot.lane.b32.xlu1 %v1672_v45, %s1475_s9 }
  0x44   : > { %730 = vrot.lane.b32.xlu0 %v1676_v49, %s1475_s9  ;;  %v481_v49 = vshll.u32 %v1721_v22, 16 }
  0x46   : > { %v483_v20 = vrot.slane %v481_v49, 1 }
  0x47   : > { %740 = vrot.lane.b32.xlu1 %v1781_v61, %s1475_s9 }
  0x48   : > { %732 = vrot.lane.b32.xlu0 %v1784_v6, %s1475_s9 }
  0x4b   : > { %773 = vrot.lane.b32.xlu1 %v1605_v8, %s1476_s13  ;;  %v484_v8 = vor.u32 %v483_v20, %v479_v17 }
  0x4c   : > { %765 = vrot.lane.b32.xlu0 %v1613_v12, %s1476_s13  ;;  %v1372_v12 = vld [vmem:[%s2051_s3] sm:$0xff]  }
  0x4d   : > { %1258 = vmatprep.subr.bf16.mxu0 %v1372_v12  ;;  %1280 = vmatprep.subr.bf16.mxu1 %v1372_v12  ;;  %v489_v28 = vsel %vm441_vm2, %v484_v8, %v488_v26 }
  0x4e   : > { %1259 = vmatpush3.bf16.msra.mxu0 %v1372_v12  ;;  %1283 = vmatpush3.bf16.msra.mxu1 %v1372_v12 }
  0x4f   : > { %775 = vrot.lane.b32.xlu1 %v1711_v18, %s1476_s13  ;;  %1260 = vmatprep.subr.bf16.mxu0 %v1373_v29 }
  0x50   : > { %767 = vrot.lane.b32.xlu0 %v1721_v22, %s1476_s13  ;;  %1281 = vmatprep.subr.bf16.mxu1 %v1373_v29 }
  0x52   : > { %1261 = vmatpush3.bf16.msra.mxu0 %v1373_v29  ;;  %1284 = vmatpush3.bf16.msra.mxu1 %v1373_v29 }
  0x53   : > { %819 = vrot.lane.b32.xlu1 %v1744_v38, %s1477_s16  ;;  %1286 = vmatprep.subr.msk.bf16.mxu0 %vm941_vm3, %v1374_v30 }
  0x54   : > { %811 = vrot.lane.b32.xlu0 %v1751_v42, %s1477_s16  ;;  %1287 = vmatprep.subr.msk.bf16.mxu1 %vm941_vm3, %v1374_v30 }
  0x56   : > { %1263 = vmatpush3.bf16.msra.mxu0 %v943_v31  ;;  %1285 = vmatpush3.bf16.msra.mxu1 %v943_v31 }
  0x57   : > { %821 = vrot.lane.b32.xlu1 %v537_v27, %s1477_s16 }
  0x58   : > { %813 = vrot.lane.b32.xlu0 %v489_v28, %s1477_s16 }
  0x5b   : > { %856 = vrot.lane.b32.xlu1 %v1781_v61, %s1478_s14 }
  0x5c   : > { %848 = vrot.lane.b32.xlu0 %v1784_v6, %s1478_s14 }
  0x5f   : > { %550 = vrot.lane.b32.xlu1 %v1744_v38, %s1473_s10 }
  0x60   : > { %542 = vrot.lane.b32.xlu0 %v1751_v42, %s1473_s10 }
  0x63   : > { %858 = vrot.lane.b32.xlu1 %v611_v40, %s1478_s14 }
  0x64   : > { %850 = vrot.lane.b32.xlu0 %v599_v41, %s1478_s14 }
  0x67   : > { %552 = vrot.lane.b32.xlu1 %v537_v27, %s1473_s10 }
  0x68   : > { %544 = vrot.lane.b32.xlu0 %v489_v28, %s1473_s10 }
  0x6b   : > { %624 = vrot.lane.b32.xlu1 %v1781_v61, %s1472_s17 }
  0x6c   : > { %616 = vrot.lane.b32.xlu0 %v1784_v6, %s1472_s17 }
  0x6f   : > { %626 = vrot.lane.b32.xlu1 %v611_v40, %s1472_s17 }
  0x70   : > { %618 = vrot.lane.b32.xlu0 %v599_v41, %s1472_s17 }
  0x73   : > { %659 = vrot.lane.b32.xlu1 %v1711_v18, %s1471_s12 }
  0x74   : > { %651 = vrot.lane.b32.xlu0 %v1721_v22, %s1471_s12 }
  0x77   : > { %661 = vrot.lane.b32.xlu1 %v1737_v33, %s1471_s12 }
  0x78   : > { %653 = vrot.lane.b32.xlu0 %v1623_v16, %s1471_s12  ;;  %s332_s12 = sand.u32 1, %s1445_s19  }
  0x79   : > { %s1210_s10 = sshll.u32 %s332_s12, 7 }
  0x7b   : > { %705 = vrot.lane.b32.xlu1 %v537_v27, %s1474_s15 }
  0x7c   : > { %697 = vrot.lane.b32.xlu0 %v489_v28, %s1474_s15 }
  0x7f   : > { %707 = vrot.lane.b32.xlu1 %v1771_v2, %s1474_s15 }
  0x80   : > { %699 = vrot.lane.b32.xlu0 %v1727_v23, %s1474_s15 }
  0x83   : > { %742 = vrot.lane.b32.xlu1 %v611_v40, %s1475_s9 }
  0x84   : > { %734 = vrot.lane.b32.xlu0 %v599_v41, %s1475_s9 }
  0x87   : > { %744 = vrot.lane.b32.xlu1 %v1757_v53, %s1475_s9 }
  0x88   : > { %736 = vrot.lane.b32.xlu0 %v1657_v35, %s1475_s9  ;;  %s1479_s9 = smov [#allocation3]  }
  0x8b   : > { %777 = vrot.lane.b32.xlu1 %v1737_v33, %s1476_s13 }
  0x8c   : > { %769 = vrot.lane.b32.xlu0 %v1623_v16, %s1476_s13 }
  0x8f   : > { %779 = vrot.lane.b32.xlu1 %v1739_v37, %s1476_s13 }
  0x90   : > { %771 = vrot.lane.b32.xlu0 %v1598_v3, %s1476_s13  ;;  %s1965_s13 = scalar_lea.vmem [#allocation3], %s1210_s10  ;;  %s1995_s10 = scalar_lea.sflag [#allocation4], %s332_s12 }
  0x91   : > { %s1074_s8 = sshll.u32 %s1965_s13, 4  ;;  %s1988_s8 = int_to_ptr.vmem [resolvable:$true] %s1074_s8 }
  0x92   : > { %s1375_s15 = scalar_lea.vmem %s1988_s8, 2048 }
  0x93   : > { %823 = vrot.lane.b32.xlu1 %v1771_v2, %s1477_s16  ;;  %p1376_p2 = scmp.ne.s32.totalorder %s1988_s8, %s1375_s15 }
  0x94   : > { %815 = vrot.lane.b32.xlu0 %v1727_v23, %s1477_s16 }
  0x95   : > { %v656_v18 = vpop.permute.xlu1 %655  ;;  %p1377_p4 = pnand %p1376_p2, %p1562_p3 }
  0x96   : > { %v648_v22 = vpop.permute.xlu0 %647 }
  0x97   : > { %825 = vrot.lane.b32.xlu1 %v1776_v5, %s1477_s16  ;;  %p1378_p5 = pneg %p1377_p4 }
  0x98   : > { %817 = vrot.lane.b32.xlu0 %v1718_v19, %s1477_s16  ;;  %s1230_s16 = sshll.u32 %s1453_s21, 4 }
  0x99   : > { %v658_v16 = vpop.permute.xlu1 %657  ;;  %s1071_s27 = sadd.s32 %s1231_s26, %s1230_s16  ;;  %s1379_s16 = sshll.u32 %s1479_s9, 4  ;;  %s1380_s16 = int_to_ptr.vmem [resolvable:$false] %s1379_s16 }
  0x9a   : > { %v650_v33 = vpop.permute.xlu0 %649  ;;  %s1232_s30 = sshll.u32 %s1071_s27, 7  ;;  %s1381_s26 = scalar_lea.vmem %s1380_s16, 4096 }
  0x9b   : > { %860 = vrot.lane.b32.xlu1 %v1757_v53, %s1478_s14  ;;  %p1382_p6 = scmp.lt.s32.totalorder %s1988_s8, %s1380_s16  ;;  %p1383_p7 = scmp.lt.s32.totalorder %s1381_s26, %s1375_s15 }
  0x9c   : > { %852 = vrot.lane.b32.xlu0 %v1657_v35, %s1478_s14 }
  0x9d   : > { %v621_v3 = vpop.permute.xlu1 %620  ;;  %p1384_p9 = por %p1383_p7, %p1382_p6 }
  0x9e   : > { %v613_v37 = vpop.permute.xlu0 %612 }
  0x9f   : > { %862 = vrot.lane.b32.xlu1 %v1766_v62, %s1478_s14  ;;  %p1385_p10 = pnand %p1384_p9, %p1378_p5 }
  0xa0   : > { %854 = vrot.lane.b32.xlu0 %v1672_v45, %s1478_s14  ;;  %s1984_s14 = scalar_lea.hbm %s2053_s5, %s1232_s30 }
  0xa1   : > { %v623_v23 = vpop.permute.xlu1 %622 }
  0xa2   : > { %v615_v38 = vpop.permute.xlu0 %614 }
  0xa5   : > { %v541_v19 = vpop.permute.xlu1 %540 }
  0xa6   : > { %564 = vst.msk [vmem:[#allocation2 + $0x8] sm:$0xff] %vm562_vm4, %v541_v19  ;;  %v539_v42 = vpop.permute.xlu0 %538  ;;  %v1217_v19 = vld [vmem:[%s2052_s4] ss:$0 sm:$0xff] }
  0xa7   : > { %638 = vst.msk [vmem:[#allocation2 + $0x8] sm:$0xff] %vm636_vm5, %v615_v38 }
  0xa8   : > { %563 = vst.msk [vmem:[#allocation2] sm:$0xff] %vm562_vm4, %v539_v42 }
  0xa9   : > { %637 = vst.msk [vmem:[#allocation2] sm:$0xff] %vm636_vm5, %v613_v37  ;;  %v549_v35 = vpop.permute.xlu1 %548 }
  0xaa   : > { %673 = vst.msk [vmem:[#allocation2 + $0x8] sm:$0xff] %vm671_vm6, %v650_v33  ;;  %672 = vst.msk [vmem:[#allocation2] sm:$0xff] %vm671_vm6, %v648_v22  ;;  %v547_v45 = vpop.permute.xlu0 %546 }
  0xab   : > { %568 = vst.msk [vmem:[#allocation2 + $0x28] sm:$0xff] %vm562_vm4, %v549_v35  ;;  %567 = vst.msk [vmem:[#allocation2 + $0x20] sm:$0xff] %vm562_vm4, %v547_v45 }
  0xac   : > { %642 = vst.msk [vmem:[#allocation2 + $0x28] sm:$0xff] %vm636_vm5, %v623_v23  ;;  %641 = vst.msk [vmem:[#allocation2 + $0x20] sm:$0xff] %vm636_vm5, %v621_v3 }
  0xad   : > { %677 = vst.msk [vmem:[#allocation2 + $0x28] sm:$0xff] %vm671_vm6, %v658_v16  ;;  %v702_v43 = vpop.permute.xlu1 %701  ;;  %676 = vst.msk [vmem:[#allocation2 + $0x20] sm:$0xff] %vm671_vm6, %v656_v18 }
  0xae   : > { %722 = vst.msk [vmem:[#allocation2 + $0x20] sm:$0xff] %vm717_vm7, %v702_v43  ;;  %v694_v44 = vpop.permute.xlu0 %693 }
  0xaf   : > { %718 = vst.msk [vmem:[#allocation2] sm:$0xff] %vm717_vm7, %v694_v44 }
  0xb1   : > { %v704_v46 = vpop.permute.xlu1 %703 }
  0xb2   : > { %723 = vst.msk [vmem:[#allocation2 + $0x28] sm:$0xff] %vm717_vm7, %v704_v46  ;;  %v696_v47 = vpop.permute.xlu0 %695 }
  0xb3   : > { %719 = vst.msk [vmem:[#allocation2 + $0x8] sm:$0xff] %vm717_vm7, %v696_v47 }
  0xb5   : > { %v739_v48 = vpop.permute.xlu1 %738 }
  0xb6   : > { %759 = vst.msk [vmem:[#allocation2 + $0x20] sm:$0xff] %vm754_vm8, %v739_v48  ;;  %v731_v50 = vpop.permute.xlu0 %730 }
  0xb7   : > { %755 = vst.msk [vmem:[#allocation2] sm:$0xff] %vm754_vm8, %v731_v50 }
  0xb9   : > { %v741_v51 = vpop.permute.xlu1 %740 }
  0xba   : > { %760 = vst.msk [vmem:[#allocation2 + $0x28] sm:$0xff] %vm754_vm8, %v741_v51  ;;  %v733_v52 = vpop.permute.xlu0 %732 }
  0xbb   : > { %756 = vst.msk [vmem:[#allocation2 + $0x8] sm:$0xff] %vm754_vm8, %v733_v52 }
  0xbd   : > { %v774_v53 = vpop.permute.xlu1 %773 }
  0xbe   : > { %794 = vst.msk [vmem:[#allocation2 + $0x20] sm:$0xff] %vm789_vm9, %v774_v53  ;;  %v766_v54 = vpop.permute.xlu0 %765 }
  0xbf   : > { %790 = vst.msk [vmem:[#allocation2] sm:$0xff] %vm789_vm9, %v766_v54 }
  0xc1   : > { %v776_v55 = vpop.permute.xlu1 %775 }
  0xc2   : > { %795 = vst.msk [vmem:[#allocation2 + $0x28] sm:$0xff] %vm789_vm9, %v776_v55  ;;  %v768_v56 = vpop.permute.xlu0 %767 }
  0xc3   : > { %791 = vst.msk [vmem:[#allocation2 + $0x8] sm:$0xff] %vm789_vm9, %v768_v56 }
  0xc5   : > { %v820_v57 = vpop.permute.xlu1 %819 }
  0xc6   : > { %840 = vst.msk [vmem:[#allocation2 + $0x20] sm:$0xff] %vm835_vm10, %v820_v57  ;;  %v812_v58 = vpop.permute.xlu0 %811 }
  0xc7   : > { %836 = vst.msk [vmem:[#allocation2] sm:$0xff] %vm835_vm10, %v812_v58 }
  0xc9   : > { %v822_v59 = vpop.permute.xlu1 %821 }
  0xca   : > { %841 = vst.msk [vmem:[#allocation2 + $0x28] sm:$0xff] %vm835_vm10, %v822_v59  ;;  %v814_v60 = vpop.permute.xlu0 %813 }
  0xcb   : > { %837 = vst.msk [vmem:[#allocation2 + $0x8] sm:$0xff] %vm835_vm10, %v814_v60 }
  0xcd   : > { %v857_v62 = vpop.permute.xlu1 %856 }
  0xce   : > { %877 = vst.msk [vmem:[#allocation2 + $0x20] sm:$0xff] %vm872_vm11, %v857_v62  ;;  %v849_v63 = vpop.permute.xlu0 %848 }
  0xcf   : > { %873 = vst.msk [vmem:[#allocation2] sm:$0xff] %vm872_vm11, %v849_v63 }
  0xd1   : > { %v551_v0 = vpop.permute.xlu1 %550 }
  0xd2   : > { %569 = vst.msk [vmem:[#allocation2 + $0x30] sm:$0xff] %vm562_vm4, %v551_v0  ;;  %v543_v2 = vpop.permute.xlu0 %542 }
  0xd3   : > { %565 = vst.msk [vmem:[#allocation2 + $0x10] sm:$0xff] %vm562_vm4, %v543_v2 }
  0xd5   : > { %v859_v4 = vpop.permute.xlu1 %858  ;;  %v885_v5 = vld [vmem:[#allocation2 + $0x20] sm:$0xff] }
  0xd6   : > { %878 = vst.msk [vmem:[#allocation2 + $0x28] sm:$0xff] %vm872_vm11, %v859_v4  ;;  %v851_v61 = vpop.permute.xlu0 %850  ;;  %v881_v6 = vld [vmem:[#allocation2] sm:$0xff]  ;;  %1272 = vmatprep.mubr.msk.bf16.mxu1 %vm916_vm12, %v885_v5 }
  0xd7   : > { %874 = vst.msk [vmem:[#allocation2 + $0x8] sm:$0xff] %vm872_vm11, %v851_v61  ;;  %1264 = vmatprep.mubr.msk.bf16.mxu0 %vm916_vm12, %v881_v6 }
  0xd9   : > { %v553_v1 = vpop.permute.xlu1 %552 }
  0xda   : > { %570 = vst.msk [vmem:[#allocation2 + $0x38] sm:$0xff] %vm562_vm4, %v553_v1  ;;  %v545_v7 = vpop.permute.xlu0 %544 }
  0xdb   : > { %566 = vst.msk [vmem:[#allocation2 + $0x18] sm:$0xff] %vm562_vm4, %v545_v7 }
  0xdd   : > { %v625_v9 = vpop.permute.xlu1 %624  ;;  %v886_v10 = vld [vmem:[#allocation2 + $0x28] sm:$0xff] }
  0xde   : > { %643 = vst.msk [vmem:[#allocation2 + $0x30] sm:$0xff] %vm636_vm5, %v625_v9  ;;  %v617_v11 = vpop.permute.xlu0 %616  ;;  %v882_v49 = vld [vmem:[#allocation2 + $0x8] sm:$0xff]  ;;  %1273 = vmatmul.mubr.msk.bf16.vlgmr.msra.gmra.mrb[0].mxu1 %vm916_vm12, %v886_v10 }
  0xdf   : > { %639 = vst.msk [vmem:[#allocation2 + $0x10] sm:$0xff] %vm636_vm5, %v617_v11  ;;  %1265 = vmatmul.mubr.msk.bf16.vlgmr.msra.gmra.mrb[0].mxu0 %vm916_vm12, %v882_v49 }
  0xe1   : > { %v627_v13 = vpop.permute.xlu1 %626 }
  0xe2   : > { %644 = vst.msk [vmem:[#allocation2 + $0x38] sm:$0xff] %vm636_vm5, %v627_v13  ;;  %v619_v14 = vpop.permute.xlu0 %618 }
  0xe3   : > { %640 = vst.msk [vmem:[#allocation2 + $0x18] sm:$0xff] %vm636_vm5, %v619_v14 }
  0xe5   : > { %v660_v15 = vpop.permute.xlu1 %659 }
  0xe6   : > { %678 = vst.msk [vmem:[#allocation2 + $0x30] sm:$0xff] %vm671_vm6, %v660_v15  ;;  %v652_v17 = vpop.permute.xlu0 %651 }
  0xe7   : > { %674 = vst.msk [vmem:[#allocation2 + $0x10] sm:$0xff] %vm671_vm6, %v652_v17 }
  0xe9   : > { %v662_v20 = vpop.permute.xlu1 %661 }
  0xea   : > { %679 = vst.msk [vmem:[#allocation2 + $0x38] sm:$0xff] %vm671_vm6, %v662_v20  ;;  %v654_v21 = vpop.permute.xlu0 %653 }
  0xeb   : > { %675 = vst.msk [vmem:[#allocation2 + $0x18] sm:$0xff] %vm671_vm6, %v654_v21 }
  0xed   : > { %v706_v24 = vpop.permute.xlu1 %705 }
  0xee   : > { %724 = vst.msk [vmem:[#allocation2 + $0x30] sm:$0xff] %vm717_vm7, %v706_v24  ;;  %v698_v25 = vpop.permute.xlu0 %697 }
  0xef   : > { %720 = vst.msk [vmem:[#allocation2 + $0x10] sm:$0xff] %vm717_vm7, %v698_v25 }
  0xf1   : > { %v708_v8 = vpop.permute.xlu1 %707 }
  0xf2   : > { %725 = vst.msk [vmem:[#allocation2 + $0x38] sm:$0xff] %vm717_vm7, %v708_v8  ;;  %v700_v26 = vpop.permute.xlu0 %699 }
  0xf3   : > { %721 = vst.msk [vmem:[#allocation2 + $0x18] sm:$0xff] %vm717_vm7, %v700_v26 }
  0xf5   : > { %v743_v12 = vpop.permute.xlu1 %742 }
  0xf6   : > { %761 = vst.msk [vmem:[#allocation2 + $0x30] sm:$0xff] %vm754_vm8, %v743_v12  ;;  %v735_v27 = vpop.permute.xlu0 %734 }
  0xf7   : > { %757 = vst.msk [vmem:[#allocation2 + $0x10] sm:$0xff] %vm754_vm8, %v735_v27 }
  0xf9   : > { %v745_v28 = vpop.permute.xlu1 %744 }
  0xfa   : > { %762 = vst.msk [vmem:[#allocation2 + $0x38] sm:$0xff] %vm754_vm8, %v745_v28  ;;  %v737_v29 = vpop.permute.xlu0 %736 }
  0xfb   : > { %758 = vst.msk [vmem:[#allocation2 + $0x18] sm:$0xff] %vm754_vm8, %v737_v29 }
  0xfd   : > { %v778_v30 = vpop.permute.xlu1 %777 }
  0xfe   : > { %796 = vst.msk [vmem:[#allocation2 + $0x30] sm:$0xff] %vm789_vm9, %v778_v30  ;;  %v770_v31 = vpop.permute.xlu0 %769 }
  0xff   : > { %792 = vst.msk [vmem:[#allocation2 + $0x10] sm:$0xff] %vm789_vm9, %v770_v31 }
 0x101   : > { %v780_v32 = vpop.permute.xlu1 %779 }
 0x102   : > { %797 = vst.msk [vmem:[#allocation2 + $0x38] sm:$0xff] %vm789_vm9, %v780_v32  ;;  %v772_v34 = vpop.permute.xlu0 %771 }
 0x103   : > { %793 = vst.msk [vmem:[#allocation2 + $0x18] sm:$0xff] %vm789_vm9, %v772_v34 }
 0x105   : > { %v824_v36 = vpop.permute.xlu1 %823 }
 0x106   : > { %842 = vst.msk [vmem:[#allocation2 + $0x30] sm:$0xff] %vm835_vm10, %v824_v36  ;;  %v816_v39 = vpop.permute.xlu0 %815 }
 0x107   : > { %838 = vst.msk [vmem:[#allocation2 + $0x10] sm:$0xff] %vm835_vm10, %v816_v39 }
 0x109   : > { %v826_v40 = vpop.permute.xlu1 %825 }
 0x10a   : > { %843 = vst.msk [vmem:[#allocation2 + $0x38] sm:$0xff] %vm835_vm10, %v826_v40  ;;  %v818_v41 = vpop.permute.xlu0 %817 }
 0x10b   : > { %839 = vst.msk [vmem:[#allocation2 + $0x18] sm:$0xff] %vm835_vm10, %v818_v41 }
 0x10d   : > { %v861_v18 = vpop.permute.xlu1 %860 }
 0x10e   : > { %879 = vst.msk [vmem:[#allocation2 + $0x30] sm:$0xff] %vm872_vm11, %v861_v18  ;;  %v853_v22 = vpop.permute.xlu0 %852 }
 0x10f   : > { %875 = vst.msk [vmem:[#allocation2 + $0x10] sm:$0xff] %vm872_vm11, %v853_v22 }
 0x111   : > { %v863_v16 = vpop.permute.xlu1 %862 }
 0x112   : > { %880 = vst.msk [vmem:[#allocation2 + $0x38] sm:$0xff] %vm872_vm11, %v863_v16  ;;  %v855_v33 = vpop.permute.xlu0 %854 }
 0x113   : > { %876 = vst.msk [vmem:[#allocation2 + $0x18] sm:$0xff] %vm872_vm11, %v855_v33 }
 0x115   : > { %v887_v3 = vld [vmem:[#allocation2 + $0x30] sm:$0xff] }
 0x116   : > { %v883_v37 = vld [vmem:[#allocation2 + $0x10] sm:$0xff]  ;;  %1276 = vmatprep.mubr.msk.bf16.mxu1 %vm916_vm12, %v887_v3 }
 0x117   : > { %1268 = vmatprep.mubr.msk.bf16.mxu0 %vm916_vm12, %v883_v37 }
 0x119   : > { %v888_v23 = vld [vmem:[#allocation2 + $0x38] sm:$0xff] }
 0x11a   : > { %v884_v38 = vld [vmem:[#allocation2 + $0x18] sm:$0xff]  ;;  %1277 = vmatmul.mubr.msk.bf16.gmra.mrb[4].mxu1 %vm916_vm12, %v888_v23 }
 0x11b   : > { %1269 = vmatmul.mubr.msk.bf16.gmra.mrb[4].mxu0 %vm916_vm12, %v884_v38 }
 0x1b1   : > { %v1274_v42 = vpop.f32.mrb[0].mxu1 }
 0x1b2   : > { %v1266_v35 = vpop.f32.mrb[0].mxu0  ;;  %v1020_v45 = vadd.f32 %v1274_v42, %v1217_v19  ;;  %v1011_v43 = vpop.f32.mrb[1].mxu1 }
 0x1b3   : > { %v988_v44 = vadd.f32 %v1266_v35, %v1217_v19  ;;  %v979_v46 = vpop.f32.mrb[1].mxu0  ;;  %v1012_v47 = vadd.f32 %v1217_v19, %v1011_v43  ;;  %v1275_v48 = vpop.f32.mrb[2].mxu1 }
 0x1b4   : > { %1052 = vst [vmem:[%s1965_s13 + $0x50] sm:$0xff] %v1020_v45  ;;  %v980_v50 = vadd.f32 %v1217_v19, %v979_v46  ;;  %v1267_v51 = vpop.f32.mrb[2].mxu0  ;;  %v1023_v52 = vadd.f32 %v1275_v48, %v1217_v19  ;;  %v1014_v53 = vpop.f32.mrb[3].mxu1 }
 0x1b5   : > { %1044 = vst [vmem:[%s1965_s13 + $0x10] sm:$0xff] %v988_v44  ;;  %1050 = vst [vmem:[%s1965_s13 + $0x40] sm:$0xff] %v1012_v47  ;;  %v991_v54 = vadd.f32 %v1267_v51, %v1217_v19  ;;  %v982_v55 = vpop.f32.mrb[3].mxu0  ;;  %v1015_v56 = vadd.f32 %v1217_v19, %v1014_v53 }
 0x1b6   : > { %1042 = vst [vmem:[%s1965_s13] sm:$0xff] %v980_v50  ;;  %1053 = vst [vmem:[%s1965_s13 + $0x58] sm:$0xff] %v1023_v52  ;;  %v983_v57 = vadd.f32 %v1217_v19, %v982_v55 }
 0x1b7   : > { %1045 = vst [vmem:[%s1965_s13 + $0x18] sm:$0xff] %v991_v54  ;;  %1051 = vst [vmem:[%s1965_s13 + $0x48] sm:$0xff] %v1015_v56 }
 0x1b8   : > { %1043 = vst [vmem:[%s1965_s13 + $0x8] sm:$0xff] %v983_v57 }
 0x1ed   : > { %v1278_v58 = vpop.f32.mrb[4].mxu1 }
 0x1ee   : > { %v1270_v59 = vpop.f32.mrb[4].mxu0  ;;  %v1036_v60 = vadd.f32 %v1278_v58, %v1217_v19  ;;  %v1027_v62 = vpop.f32.mrb[5].mxu1 }
 0x1ef   : > { %v1004_v63 = vadd.f32 %v1270_v59, %v1217_v19  ;;  %v995_v0 = vpop.f32.mrb[5].mxu0  ;;  %v1028_v2 = vadd.f32 %v1217_v19, %v1027_v62  ;;  %v1279_v4 = vpop.f32.mrb[6].mxu1 }
 0x1f0   : > { %1056 = vst [vmem:[%s1965_s13 + $0x70] sm:$0xff] %v1036_v60  ;;  %v996_v5 = vadd.f32 %v1217_v19, %v995_v0  ;;  %v1271_v61 = vpop.f32.mrb[6].mxu0  ;;  %v1039_v6 = vadd.f32 %v1279_v4, %v1217_v19  ;;  %v1030_v1 = vpop.f32.mrb[7].mxu1 }
 0x1f1   : > { %1048 = vst [vmem:[%s1965_s13 + $0x30] sm:$0xff] %v1004_v63  ;;  %1054 = vst [vmem:[%s1965_s13 + $0x60] sm:$0xff] %v1028_v2  ;;  %v1007_v7 = vadd.f32 %v1271_v61, %v1217_v19  ;;  %v998_v9 = vpop.f32.mrb[7].mxu0  ;;  %v1031_v10 = vadd.f32 %v1217_v19, %v1030_v1 }
 0x1f2   : > { %1046 = vst [vmem:[%s1965_s13 + $0x20] sm:$0xff] %v996_v5  ;;  %1057 = vst [vmem:[%s1965_s13 + $0x78] sm:$0xff] %v1039_v6  ;;  %v999_v11 = vadd.f32 %v1217_v19, %v998_v9 }
 0x1f3   : > { %1049 = vst [vmem:[%s1965_s13 + $0x38] sm:$0xff] %v1007_v7  ;;  %1055 = vst [vmem:[%s1965_s13 + $0x68] sm:$0xff] %v1031_v10 }
 0x1f4   : > { %1047 = vst [vmem:[%s1965_s13 + $0x28] sm:$0xff] %v999_v11 }
 0x1f5   : > { %1388 = shalt.err (!%p1385_p10)
}
 0x1f6   : > { %s1389_s12 = scalar_lea.hbm %s1984_s14, 2048  ;;  %s1393_s30 = scalar_lea.hbm %s2053_s5, 8192 }
 0x1f7   : > { %p1390_p11 = scmp.ne.s32.totalorder %s1984_s14, %s1389_s12  ;;  %p1394_p0 = scmp.lt.u32.totalorder %s1984_s14, %s2053_s5 }
 0x1f8   : > { %p1395_p1 = scmp.lt.u32.totalorder %s1393_s30, %s1389_s12  ;;  %p1397_p4 = scmp.lt.u32.totalorder %s1389_s12, %s1984_s14 }
 0x1f9   : > { %p1391_p12 = pnand %p1390_p11, %p1562_p3 }
 0x1fa   : > { %p1396_p2 = por %p1395_p1, %p1394_p0 }
 0x1fb   : > { %p1392_p13 = pneg %p1391_p12 }
 0x1fc   : > { %p1398_p5 = por %p1397_p4, %p1396_p2 }
 0x1fe   : > { %p1399_p6 = pnand %p1398_p5, %p1392_p13 }
 0x200   : > { %1402 = shalt.err (!%p1399_p6)
}
 0x201   : > { %s1480_s15 = smov 128  }
 0x202   : > { %1292 = dma.vmem_to_hbm [thread:$0]  (%p1562_p3), %s1988_s8, 2048, %s1984_s14, %s1995_s10, %s1480_s15, %s1480_s15, %s1472_s17  }
 0x203 PF: > { %p1298_p7 = scmp.ge.s32.totalorder %s1469_s25, 2  ;;  %s1089_s9 = sand.u32 1, %s1441_s18  }
 0x204   : > { %s1090_s16 = scalar_lea.sflag [#allocation4], %s1089_s9 }
 0x205   : > { %p1295_p9 = pnand %p1298_p7, %p1571_p8 }
 0x207   : > { %1436 = dma.done.wait (!%p1295_p9), %s1090_s16, 2048  }
 0x208   : > { %1438 = vsyncadd (!%p1295_p9), %s1090_s16, 4294965248  ;;  %s18_s25 = sadd.s32 1, %s1469_s25   ;;  %s2057_s18 = smov %s1445_s19 }
 0x209   : > { %p15_p10 = scmp.ge.s32.totalorder %s18_s25, 6   ;;  %s2058_s19 = smov %s1449_s20 }
 0x20a   : > { %s2059_s20 = smov %s1580_s11  ;;  %s2060_s21 = smov %s1461_s23 }
 0x20b   : > { %s2061_s22 = smov %s1465_s24  ;;  %s2062_s23 = smov %s2065_s28 }
 0x20c   : > { %s2063_s24 = smov %s2069_s29  ;;  %17 = sbr.rel (!%p15_p10) target bundleno = 5 (0x5), region = 81 }
 0x213   :  { %1095 = vsyncpa [#allocation4], 1 }
 0x214   :  { %1097 = vsyncpa [#allocation4 + $0x1], 1 }

</bundles_post_ra>
